<compile_context>
chip_gen: v6e
topology: v6e:2x2x1
jax: 0.10.0
libtpu: 0.0.40
codegen_flags: <defaults>
</compile_context>

<pallas_src>
import functools

import jax
import jax.numpy as jnp
import numpy as np
from jax import lax
from jax.experimental import pallas as pl
from jax.experimental.pallas import tpu as pltpu

BN_EPS = 1e-5
LANE = 128                       # lane width: last-dim tiling unit
TM_DEFAULT = 256                 # M-tile: multiple of 256 for v6e/v7x MXU (128 ok on v5e)
_VMEM_LIMIT = 48 * 1024 * 1024   # headroom under v7x's 64 MiB VMEM


def _round_up(x, m):
    return (x + m - 1) // m * m


# ------------------------------ Pallas kernels ------------------------------ #

def _matmul_stats_kernel(p_ref, w_ref, y_ref, sum_ref, sq_ref):
    """One M-tile of the im2col matmul + per-channel sum / sum-of-squares.

    p_ref: (TM, Kpad) bf16, w_ref: (Kpad, Cpad) bf16 (resident).
    y_ref: (TM, Cpad) f32 per-tile conv output.
    sum_ref/sq_ref: (1, Cpad) f32 resident accumulators (constant index_map).
    """
    @pl.when(pl.program_id(0) == 0)
    def _init():
        sum_ref[...] = jnp.zeros_like(sum_ref)
        sq_ref[...] = jnp.zeros_like(sq_ref)

    y = jnp.dot(p_ref[...], w_ref[...], preferred_element_type=jnp.float32)
    y_ref[...] = y
    sum_ref[...] += jnp.sum(y, axis=0, keepdims=True)
    sq_ref[...] += jnp.sum(y * y, axis=0, keepdims=True)


def _affine_relu_kernel(y_ref, sc_ref, sh_ref, o_ref):
    """out = relu(y * scale + shift)   (BN with precomputed scale/shift)."""
    yb = y_ref[...] * sc_ref[...] + sh_ref[...]          # f32 elementwise
    o_ref[...] = jnp.maximum(yb, 0.0).astype(o_ref.dtype)


def _make_affine_add_relu_kernel(c_res, c_pad):
    """out = relu(y*scale + shift + residual); residual only covers the first
    c_res channels (the zero-channel concat is never materialized in HBM)."""

    def kernel(y_ref, sc_ref, sh_ref, res_ref, o_ref):
        yb = y_ref[...] * sc_ref[...] + sh_ref[...]
        if c_res == c_pad:
            o_ref[...] = jnp.maximum(yb + res_ref[...], 0.0).astype(o_ref.dtype)
        else:
            # Full lane-dense store, then a small masked store for the
            # residual-carrying leading channels.
            o_ref[...] = jnp.maximum(yb, 0.0).astype(o_ref.dtype)
            o_ref[:, :c_res] = jnp.maximum(
                yb[:, :c_res] + res_ref[...], 0.0).astype(o_ref.dtype)

    return kernel


# ---------------------------- pallas_call wrappers --------------------------- #

def _conv_matmul_stats(p, w, tm):
    m_pad, kpad = p.shape
    cpad = w.shape[1]
    return pl.pallas_call(
        _matmul_stats_kernel,
        out_shape=(jax.ShapeDtypeStruct((m_pad, cpad), jnp.float32),
                   jax.ShapeDtypeStruct((1, cpad), jnp.float32),
                   jax.ShapeDtypeStruct((1, cpad), jnp.float32)),
        grid=(m_pad // tm,),
        in_specs=[pl.BlockSpec((tm, kpad), lambda i: (i, 0)),
                  pl.BlockSpec((kpad, cpad), lambda i: (0, 0))],
        out_specs=(pl.BlockSpec((tm, cpad), lambda i: (i, 0)),
                   pl.BlockSpec((1, cpad), lambda i: (0, 0)),
                   pl.BlockSpec((1, cpad), lambda i: (0, 0))),
        compiler_params=pltpu.CompilerParams(
            dimension_semantics=("arbitrary",),    # resident stat accumulators
            vmem_limit_bytes=_VMEM_LIMIT),
    )(p, w)


def _affine_relu(y, scale, shift, tm, out_dtype):
    m_pad, cpad = y.shape
    return pl.pallas_call(
        _affine_relu_kernel,
        out_shape=jax.ShapeDtypeStruct((m_pad, cpad), out_dtype),
        grid=(m_pad // tm,),
        in_specs=[pl.BlockSpec((tm, cpad), lambda i: (i, 0)),
                  pl.BlockSpec((1, cpad), lambda i: (0, 0)),
                  pl.BlockSpec((1, cpad), lambda i: (0, 0))],
        out_specs=pl.BlockSpec((tm, cpad), lambda i: (i, 0)),
        compiler_params=pltpu.CompilerParams(
            dimension_semantics=("parallel",),     # independent tiles -> 2 TCs on v7x
            vmem_limit_bytes=_VMEM_LIMIT),
    )(y, scale, shift)


def _affine_add_relu(y, scale, shift, res, tm, out_dtype):
    m_pad, cpad = y.shape
    c_res = res.shape[1]
    return pl.pallas_call(
        _make_affine_add_relu_kernel(c_res, cpad),
        out_shape=jax.ShapeDtypeStruct((m_pad, cpad), out_dtype),
        grid=(m_pad // tm,),
        in_specs=[pl.BlockSpec((tm, cpad), lambda i: (i, 0)),
                  pl.BlockSpec((1, cpad), lambda i: (0, 0)),
                  pl.BlockSpec((1, cpad), lambda i: (0, 0)),
                  pl.BlockSpec((tm, c_res), lambda i: (i, 0))],
        out_specs=pl.BlockSpec((tm, cpad), lambda i: (i, 0)),
        compiler_params=pltpu.CompilerParams(
            dimension_semantics=("parallel",),
            vmem_limit_bytes=_VMEM_LIMIT),
    )(y, scale, shift, res)


# --------------------------------- glue (JAX) -------------------------------- #

def _im2col(x_nhwc, stride):
    """3x3 patches with padding=1 and given stride -> ([N*Ho*Wo, 9*C], dims).

    Patch channel order is (kh, kw, c), matching a [3,3,Cin,Cout] weight
    reshaped to [9*Cin, Cout]."""
    n, h, w, c = x_nhwc.shape
    xp = jnp.pad(x_nhwc, ((0, 0), (1, 1), (1, 1), (0, 0)))
    ho = (h + 2 - 3) // stride + 1
    wo = (w + 2 - 3) // stride + 1
    taps = []
    for kh in range(3):
        for kw in range(3):
            taps.append(xp[:, kh:kh + stride * (ho - 1) + 1:stride,
                           kw:kw + stride * (wo - 1) + 1:stride, :])
    patches = jnp.concatenate(taps, axis=-1)                 # [N, Ho, Wo, 9*C]
    return patches.reshape(n * ho * wo, 9 * c), (n, ho, wo)


def _bn_affine(s, sq, gamma, beta, m_real):
    """Fold batch-stat BN into per-channel scale/shift (all f32)."""
    mean = s / m_real
    var = jnp.maximum(sq / m_real - mean * mean, 0.0)        # biased variance
    inv_std = lax.rsqrt(var + BN_EPS)
    scale = gamma * inv_std
    shift = beta - mean * scale
    return scale, shift


# -------------------------------- block wrapper ------------------------------ #

@functools.partial(jax.jit, static_argnames=("stride",))
def basic_wide_res_block(x_nchw, w1, w2, g1, b1, g2, b2, *, stride):
    """x_nchw: [N, Cin, H, W]; w1: [3,3,Cin,Cout]; w2: [3,3,Cout,Cout]."""
    cin, cout = w1.shape[2], w1.shape[3]
    x = jnp.transpose(x_nchw, (0, 2, 3, 1)).astype(jnp.float32)      # -> NHWC
    x_bf = x.astype(jnp.bfloat16)                                    # bf16 matmul inputs

    # ---- padded / tiled geometry ----
    cpad = _round_up(cout, LANE)                       # lane-dense channel dim
    p1, (n, h1, w1sp) = _im2col(x_bf, stride)          # [M, 9*Cin] bf16
    m = n * h1 * w1sp
    tm = min(TM_DEFAULT, _round_up(m, LANE))           # MXU-friendly M-tile
    m_pad = _round_up(m, tm)

    k1 = 9 * cin
    k1p = _round_up(k1, LANE)
    p1 = jnp.pad(p1, ((0, m_pad - m), (0, k1p - k1)))
    w1_mat = jnp.pad(w1.reshape(k1, cout).astype(jnp.bfloat16),
                     ((0, k1p - k1), (0, cpad - cout)))
    g1p = jnp.pad(g1.astype(jnp.float32), (0, cpad - cout)).reshape(1, cpad)
    b1p = jnp.pad(b1.astype(jnp.float32), (0, cpad - cout)).reshape(1, cpad)

    # ---- conv1 -> bn1 -> relu ----
    y1_raw, s1, q1 = _conv_matmul_stats(p1, w1_mat, tm)
    sc1, sh1 = _bn_affine(s1, q1, g1p, b1p, float(m))
    y1_act = _affine_relu(y1_raw, sc1, sh1, tm, jnp.bfloat16)        # bf16 activation

    # ---- conv2 -> bn2 (+ residual) -> relu ----
    y1_nhwc = y1_act[:m, :cout].reshape(n, h1, w1sp, cout)
    p2, _ = _im2col(y1_nhwc, 1)                                      # [M, 9*Cout] bf16
    k2 = 9 * cout
    k2p = _round_up(k2, LANE)
    p2 = jnp.pad(p2, ((0, m_pad - m), (0, k2p - k2)))
    w2_mat = jnp.pad(w2.reshape(k2, cout).astype(jnp.bfloat16),
                     ((0, k2p - k2), (0, cpad - cout)))
    g2p = jnp.pad(g2.astype(jnp.float32), (0, cpad - cout)).reshape(1, cpad)
    b2p = jnp.pad(b2.astype(jnp.float32), (0, cpad - cout)).reshape(1, cpad)

    # residual path (glue): AvgPool2d(2) rearrangement only; the zero-channel
    # concat is handled inside the kernel so zeros are never written to HBM.
    res = x                                                          # f32
    if stride > 1:
        # nn.AvgPool2d(2); WRN uses stride == 2 whenever stride > 1
        res = res.reshape(n, h1, 2, w1sp, 2, cin).mean(axis=(2, 4))
    c_res = res.shape[-1]
    res2d = jnp.pad(res.reshape(m, c_res), ((0, m_pad - m), (0, 0)))

    y2_raw, s2, q2 = _conv_matmul_stats(p2, w2_mat, tm)
    sc2, sh2 = _bn_affine(s2, q2, g2p, b2p, float(m))
    out2d = _affine_add_relu(y2_raw, sc2, sh2, res2d, tm, jnp.float32)

    out = out2d[:m, :cout].reshape(n, h1, w1sp, cout)
    return jnp.transpose(out, (0, 3, 1, 2))                          # -> NCHW


# ------------------------------ pure-JAX reference --------------------------- #

@functools.partial(jax.jit, static_argnames=("stride",))
def _ref_forward(x_nchw, w1, w2, g1, b1, g2, b2, *, stride):
    cin, cout = w1.shape[2], w1.shape[3]
    w1_oihw = jnp.transpose(w1, (3, 2, 0, 1)).astype(jnp.bfloat16)
    w2_oihw = jnp.transpose(w2, (3, 2, 0, 1)).astype(jnp.bfloat16)
    dn = ("NCHW", "OIHW", "NCHW")

    def bn(y, g, b):
        m = jnp.mean(y, axis=(0, 2, 3), keepdims=True)
        v = jnp.mean((y - m) ** 2, axis=(0, 2, 3), keepdims=True)
        return ((y - m) * lax.rsqrt(v + BN_EPS) * g.reshape(1, -1, 1, 1)
                + b.reshape(1, -1, 1, 1))

    y = lax.conv_general_dilated(x_nchw.astype(jnp.bfloat16), w1_oihw,
                                 (stride, stride), ((1, 1), (1, 1)),
                                 dimension_numbers=dn,
                                 preferred_element_type=jnp.float32)
    y = jnp.maximum(bn(y, g1, b1), 0.0)
    y = lax.conv_general_dilated(y.astype(jnp.bfloat16), w2_oihw, (1, 1),
                                 ((1, 1), (1, 1)), dimension_numbers=dn,
                                 preferred_element_type=jnp.float32)
    y = bn(y, g2, b2)
    res = x_nchw
    if stride > 1:
        nn_, cc_, hh_, ww_ = res.shape
        res = res.reshape(nn_, cc_, hh_ // 2, 2, ww_ // 2, 2).mean(axis=(3, 5))
    if cin != cout:
        res = jnp.concatenate([res, jnp.zeros_like(res)], axis=1)
    return jnp.maximum(y + res, 0.0)


# ------------------------------------- main ---------------------------------- #

if __name__ == "__main__":
    def run_case(n, cin, cout, hw, stride, key):
        kx, kw1, kw2, kg1, kb1, kg2, kb2 = jax.random.split(key, 7)
        x = jax.random.normal(kx, (n, cin, hw, hw), jnp.float32)
        w1 = 0.1 * jax.random.normal(kw1, (3, 3, cin, cout), jnp.float32)
        w2 = 0.1 * jax.random.normal(kw2, (3, 3, cout, cout), jnp.float32)
        g1 = 1.0 + 0.1 * jax.random.normal(kg1, (cout,), jnp.float32)
        b1 = 0.1 * jax.random.normal(kb1, (cout,), jnp.float32)
        g2 = 1.0 + 0.1 * jax.random.normal(kg2, (cout,), jnp.float32)
        b2 = 0.1 * jax.random.normal(kb2, (cout,), jnp.float32)

        out = jax.block_until_ready(
            basic_wide_res_block(x, w1, w2, g1, b1, g2, b2, stride=stride))
        ref = jax.block_until_ready(
            _ref_forward(x, w1, w2, g1, b1, g2, b2, stride=stride))
        np.testing.assert_allclose(np.asarray(out), np.asarray(ref),
                                   rtol=1e-2, atol=1e-2)

    key = jax.random.PRNGKey(0)
    k1, k2, k3 = jax.random.split(key, 3)
    # strided, channel-doubling block (avgpool + zero-channel-concat residual)
    run_case(2, 4, 8, 16, 2, k1)
    # stride-1 identity-residual block (multi-tile grid, stat accumulation)
    run_case(2, 8, 8, 16, 1, k2)
    # M not a multiple of the tile (row padding), channel concat, no avgpool
    run_case(2, 4, 8, 12, 1, k3)

    print("KERNEL_OK")
</pallas_src>

<mosaic_0001>
module attributes {stable_mosaic.version = 11 : i64} {
  func.func @_matmul_stats_kernel(%arg0: i32, %arg1: memref<128x128xbf16, #tpu.memory_space<vmem>>, %arg2: memref<128x128xbf16, #tpu.memory_space<vmem>>, %arg3: memref<128x128xf32, #tpu.memory_space<vmem>>, %arg4: memref<1x128xf32, #tpu.memory_space<vmem>>, %arg5: memref<1x128xf32, #tpu.memory_space<vmem>>) attributes {dimension_semantics = [#tpu.dimension_semantics<arbitrary>], iteration_bounds = array<i64: 1>, scalar_prefetch = 0 : i64, scratch_operands = 0 : i64, tpu.core_type = #tpu.core_type<tc>, window_params = [{transform_indices = @transform_0, window_bounds = array<i64: 128, 128>}, {pipeline_mode = #tpu.pipeline_mode<synchronous>, transform_indices = @transform_1, window_bounds = array<i64: 128, 128>}, {transform_indices = @transform_2, window_bounds = array<i64: 128, 128>}, {pipeline_mode = #tpu.pipeline_mode<synchronous>, transform_indices = @transform_3, window_bounds = array<i64: 1, 128>}, {pipeline_mode = #tpu.pipeline_mode<synchronous>, transform_indices = @transform_4, window_bounds = array<i64: 1, 128>}]} {
    %c0_i32 = arith.constant 0 : i32
    %0 = arith.cmpi eq, %arg0, %c0_i32 : i32
    %1 = arith.extui %0 : i1 to i32
    %c0_i32_0 = arith.constant 0 : i32
    %2 = arith.cmpi ne, %1, %c0_i32_0 : i32
    scf.if %2 {
      %cst_16 = arith.constant 0.000000e+00 : f32
      %18 = vector.broadcast %cst_16 : f32 to vector<1x128xf32>
      %c0_17 = arith.constant 0 : index
      %c0_18 = arith.constant 0 : index
      %19 = vector.load %arg4[%c0_17, %c0_18] : memref<1x128xf32, #tpu.memory_space<vmem>>, vector<1x128xf32>
      tpu.vector_store %arg4[%c0_17, %c0_18], %18 {strides = array<i32>} : memref<1x128xf32, #tpu.memory_space<vmem>>, vector<1x128xf32>,
      %cst_19 = arith.constant 0.000000e+00 : f32
      %20 = vector.broadcast %cst_19 : f32 to vector<1x128xf32>
      %c0_20 = arith.constant 0 : index
      %c0_21 = arith.constant 0 : index
      %21 = vector.load %arg5[%c0_20, %c0_21] : memref<1x128xf32, #tpu.memory_space<vmem>>, vector<1x128xf32>
      tpu.vector_store %arg5[%c0_20, %c0_21], %20 {strides = array<i32>} : memref<1x128xf32, #tpu.memory_space<vmem>>, vector<1x128xf32>,
    } else {
    }
    %c0 = arith.constant 0 : index
    %c0_1 = arith.constant 0 : index
    %3 = vector.load %arg1[%c0, %c0_1] : memref<128x128xbf16, #tpu.memory_space<vmem>>, vector<128x128xbf16>
    %c0_2 = arith.constant 0 : index
    %c0_3 = arith.constant 0 : index
    %4 = vector.load %arg2[%c0_2, %c0_3] : memref<128x128xbf16, #tpu.memory_space<vmem>>, vector<128x128xbf16>
    %cst = arith.constant dense<0.000000e+00> : vector<128x128xf32>
    %5 = tpu.matmul %3, %4, %cst {dimension_numbers = #tpu.dot_dimension_numbers<[1], [0], [0], [1], [0, 0, 1, 1], [], []>} : vector<128x128xbf16>, vector<128x128xbf16>, vector<128x128xf32> -> vector<128x128xf32>
    %c0_4 = arith.constant 0 : index
    %c0_5 = arith.constant 0 : index
    %6 = vector.load %arg3[%c0_4, %c0_5] : memref<128x128xf32, #tpu.memory_space<vmem>>, vector<128x128xf32>
    tpu.vector_store %arg3[%c0_4, %c0_5], %5 {strides = array<i32>} : memref<128x128xf32, #tpu.memory_space<vmem>>, vector<128x128xf32>,
    %c0_6 = arith.constant 0 : index
    %c0_7 = arith.constant 0 : index
    %7 = vector.load %arg4[%c0_6, %c0_7] : memref<1x128xf32, #tpu.memory_space<vmem>>, vector<1x128xf32>
    %cst_8 = arith.constant dense<0.000000e+00> : vector<128xf32>
    %8 = vector.multi_reduction <add>, %5, %cst_8 [0] : vector<128x128xf32> to vector<128xf32>
    %9 = vector.shape_cast %8 : vector<128xf32> to vector<1x128xf32>
    %10 = arith.addf %7, %9 : vector<1x128xf32>
    %c0_9 = arith.constant 0 : index
    %c0_10 = arith.constant 0 : index
    %11 = vector.load %arg4[%c0_9, %c0_10] : memref<1x128xf32, #tpu.memory_space<vmem>>, vector<1x128xf32>
    tpu.vector_store %arg4[%c0_9, %c0_10], %10 {strides = array<i32>} : memref<1x128xf32, #tpu.memory_space<vmem>>, vector<1x128xf32>,
    %c0_11 = arith.constant 0 : index
    %c0_12 = arith.constant 0 : index
    %12 = vector.load %arg5[%c0_11, %c0_12] : memref<1x128xf32, #tpu.memory_space<vmem>>, vector<1x128xf32>
    %13 = arith.mulf %5, %5 : vector<128x128xf32>
    %cst_13 = arith.constant dense<0.000000e+00> : vector<128xf32>
    %14 = vector.multi_reduction <add>, %13, %cst_13 [0] : vector<128x128xf32> to vector<128xf32>
    %15 = vector.shape_cast %14 : vector<128xf32> to vector<1x128xf32>
    %16 = arith.addf %12, %15 : vector<1x128xf32>
    %c0_14 = arith.constant 0 : index
    %c0_15 = arith.constant 0 : index
    %17 = vector.load %arg5[%c0_14, %c0_15] : memref<1x128xf32, #tpu.memory_space<vmem>>, vector<1x128xf32>
    tpu.vector_store %arg5[%c0_14, %c0_15], %16 {strides = array<i32>} : memref<1x128xf32, #tpu.memory_space<vmem>>, vector<1x128xf32>,
    return
  }
  func.func @transform_0(%arg0: i32) -> (i32, i32) {
    %c0_i32 = arith.constant 0 : i32
    %c0_i32_0 = arith.constant 0 : i32
    return %arg0, %c0_i32 : i32, i32
  }
  func.func @transform_1(%arg0: i32) -> (i32, i32) {
    %c0_i32 = arith.constant 0 : i32
    %c0_i32_0 = arith.constant 0 : i32
    %c0_i32_1 = arith.constant 0 : i32
    return %c0_i32, %c0_i32_0 : i32, i32
  }
  func.func @transform_2(%arg0: i32) -> (i32, i32) {
    %c0_i32 = arith.constant 0 : i32
    %c0_i32_0 = arith.constant 0 : i32
    return %arg0, %c0_i32 : i32, i32
  }
  func.func @transform_3(%arg0: i32) -> (i32, i32) {
    %c0_i32 = arith.constant 0 : i32
    %c0_i32_0 = arith.constant 0 : i32
    %c0_i32_1 = arith.constant 0 : i32
    return %c0_i32, %c0_i32_0 : i32, i32
  }
  func.func @transform_4(%arg0: i32) -> (i32, i32) {
    %c0_i32 = arith.constant 0 : i32
    %c0_i32_0 = arith.constant 0 : i32
    %c0_i32_1 = arith.constant 0 : i32
    return %c0_i32, %c0_i32_0 : i32, i32
  }
}

module attributes {stable_mosaic.version = 11 : i64} {
  func.func @_affine_relu_kernel(%arg0: i32, %arg1: memref<128x128xf32, #tpu.memory_space<vmem>>, %arg2: memref<1x128xf32, #tpu.memory_space<vmem>>, %arg3: memref<1x128xf32, #tpu.memory_space<vmem>>, %arg4: memref<128x128xbf16, #tpu.memory_space<vmem>>) attributes {dimension_semantics = [#tpu.dimension_semantics<parallel>], iteration_bounds = array<i64: 1>, scalar_prefetch = 0 : i64, scratch_operands = 0 : i64, tpu.core_type = #tpu.core_type<tc>, window_params = [{transform_indices = @transform_0, window_bounds = array<i64: 128, 128>}, {pipeline_mode = #tpu.pipeline_mode<synchronous>, transform_indices = @transform_1, window_bounds = array<i64: 1, 128>}, {pipeline_mode = #tpu.pipeline_mode<synchronous>, transform_indices = @transform_2, window_bounds = array<i64: 1, 128>}, {transform_indices = @transform_3, window_bounds = array<i64: 128, 128>}]} {
    %c0 = arith.constant 0 : index
    %c0_0 = arith.constant 0 : index
    %0 = vector.load %arg1[%c0, %c0_0] : memref<128x128xf32, #tpu.memory_space<vmem>>, vector<128x128xf32>
    %c0_1 = arith.constant 0 : index
    %c0_2 = arith.constant 0 : index
    %1 = vector.load %arg2[%c0_1, %c0_2] : memref<1x128xf32, #tpu.memory_space<vmem>>, vector<1x128xf32>
    %2 = vector.broadcast %1 : vector<1x128xf32> to vector<128x128xf32>
    %3 = arith.mulf %0, %2 : vector<128x128xf32>
    %c0_3 = arith.constant 0 : index
    %c0_4 = arith.constant 0 : index
    %4 = vector.load %arg3[%c0_3, %c0_4] : memref<1x128xf32, #tpu.memory_space<vmem>>, vector<1x128xf32>
    %5 = vector.broadcast %4 : vector<1x128xf32> to vector<128x128xf32>
    %6 = arith.addf %3, %5 : vector<128x128xf32>
    %cst = arith.constant 0.000000e+00 : f32
    %7 = vector.broadcast %cst : f32 to vector<128x128xf32>
    %8 = arith.maximumf %6, %7 : vector<128x128xf32>
    %9 = arith.truncf %8 : vector<128x128xf32> to vector<128x128xbf16>
    %c0_5 = arith.constant 0 : index
    %c0_6 = arith.constant 0 : index
    %10 = vector.load %arg4[%c0_5, %c0_6] : memref<128x128xbf16, #tpu.memory_space<vmem>>, vector<128x128xbf16>
    tpu.vector_store %arg4[%c0_5, %c0_6], %9 {strides = array<i32>} : memref<128x128xbf16, #tpu.memory_space<vmem>>, vector<128x128xbf16>,
    return
  }
  func.func @transform_0(%arg0: i32) -> (i32, i32) {
    %c0_i32 = arith.constant 0 : i32
    %c0_i32_0 = arith.constant 0 : i32
    return %arg0, %c0_i32 : i32, i32
  }
  func.func @transform_1(%arg0: i32) -> (i32, i32) {
    %c0_i32 = arith.constant 0 : i32
    %c0_i32_0 = arith.constant 0 : i32
    %c0_i32_1 = arith.constant 0 : i32
    return %c0_i32, %c0_i32_0 : i32, i32
  }
  func.func @transform_2(%arg0: i32) -> (i32, i32) {
    %c0_i32 = arith.constant 0 : i32
    %c0_i32_0 = arith.constant 0 : i32
    %c0_i32_1 = arith.constant 0 : i32
    return %c0_i32, %c0_i32_0 : i32, i32
  }
  func.func @transform_3(%arg0: i32) -> (i32, i32) {
    %c0_i32 = arith.constant 0 : i32
    %c0_i32_0 = arith.constant 0 : i32
    return %arg0, %c0_i32 : i32, i32
  }
}

module attributes {stable_mosaic.version = 11 : i64} {
  func.func @kernel(%arg0: i32, %arg1: memref<128x128xf32, #tpu.memory_space<vmem>>, %arg2: memref<1x128xf32, #tpu.memory_space<vmem>>, %arg3: memref<1x128xf32, #tpu.memory_space<vmem>>, %arg4: memref<128x4xf32, #tpu.memory_space<vmem>>, %arg5: memref<128x128xf32, #tpu.memory_space<vmem>>) attributes {dimension_semantics = [#tpu.dimension_semantics<parallel>], iteration_bounds = array<i64: 1>, scalar_prefetch = 0 : i64, scratch_operands = 0 : i64, tpu.core_type = #tpu.core_type<tc>, window_params = [{transform_indices = @transform_0, window_bounds = array<i64: 128, 128>}, {pipeline_mode = #tpu.pipeline_mode<synchronous>, transform_indices = @transform_1, window_bounds = array<i64: 1, 128>}, {pipeline_mode = #tpu.pipeline_mode<synchronous>, transform_indices = @transform_2, window_bounds = array<i64: 1, 128>}, {transform_indices = @transform_3, window_bounds = array<i64: 128, 4>}, {transform_indices = @transform_4, window_bounds = array<i64: 128, 128>}]} {
    %c0 = arith.constant 0 : index
    %c0_0 = arith.constant 0 : index
    %0 = vector.load %arg1[%c0, %c0_0] : memref<128x128xf32, #tpu.memory_space<vmem>>, vector<128x128xf32>
    %c0_1 = arith.constant 0 : index
    %c0_2 = arith.constant 0 : index
    %1 = vector.load %arg2[%c0_1, %c0_2] : memref<1x128xf32, #tpu.memory_space<vmem>>, vector<1x128xf32>
    %2 = vector.broadcast %1 : vector<1x128xf32> to vector<128x128xf32>
    %3 = arith.mulf %0, %2 : vector<128x128xf32>
    %c0_3 = arith.constant 0 : index
    %c0_4 = arith.constant 0 : index
    %4 = vector.load %arg3[%c0_3, %c0_4] : memref<1x128xf32, #tpu.memory_space<vmem>>, vector<1x128xf32>
    %5 = vector.broadcast %4 : vector<1x128xf32> to vector<128x128xf32>
    %6 = arith.addf %3, %5 : vector<128x128xf32>
    %cst = arith.constant 0.000000e+00 : f32
    %7 = vector.broadcast %cst : f32 to vector<128x128xf32>
    %8 = arith.maximumf %6, %7 : vector<128x128xf32>
    %c0_5 = arith.constant 0 : index
    %c0_6 = arith.constant 0 : index
    %9 = vector.load %arg5[%c0_5, %c0_6] : memref<128x128xf32, #tpu.memory_space<vmem>>, vector<128x128xf32>
    tpu.vector_store %arg5[%c0_5, %c0_6], %8 {strides = array<i32>} : memref<128x128xf32, #tpu.memory_space<vmem>>, vector<128x128xf32>,
    %10 = vector.extract_strided_slice %6 {offsets = [0, 0], sizes = [128, 4], strides = [1, 1]} : vector<128x128xf32> to vector<128x4xf32>
    %c0_7 = arith.constant 0 : index
    %c0_8 = arith.constant 0 : index
    %11 = vector.load %arg4[%c0_7, %c0_8] : memref<128x4xf32, #tpu.memory_space<vmem>>, vector<128x4xf32>
    %12 = arith.addf %10, %11 : vector<128x4xf32>
    %cst_9 = arith.constant 0.000000e+00 : f32
    %13 = vector.broadcast %cst_9 : f32 to vector<128x4xf32>
    %14 = arith.maximumf %12, %13 : vector<128x4xf32>
    %c0_10 = arith.constant 0 : index
    %c0_11 = arith.constant 0 : index
    %15 = vector.load %arg5[%c0_10, %c0_11] : memref<128x128xf32, #tpu.memory_space<vmem>>, vector<128x4xf32>
    tpu.vector_store %arg5[%c0_10, %c0_11], %14 {strides = array<i32>} : memref<128x128xf32, #tpu.memory_space<vmem>>, vector<128x4xf32>,
    return
  }
  func.func @transform_0(%arg0: i32) -> (i32, i32) {
    %c0_i32 = arith.constant 0 : i32
    %c0_i32_0 = arith.constant 0 : i32
    return %arg0, %c0_i32 : i32, i32
  }
  func.func @transform_1(%arg0: i32) -> (i32, i32) {
    %c0_i32 = arith.constant 0 : i32
    %c0_i32_0 = arith.constant 0 : i32
    %c0_i32_1 = arith.constant 0 : i32
    return %c0_i32, %c0_i32_0 : i32, i32
  }
  func.func @transform_2(%arg0: i32) -> (i32, i32) {
    %c0_i32 = arith.constant 0 : i32
    %c0_i32_0 = arith.constant 0 : i32
    %c0_i32_1 = arith.constant 0 : i32
    return %c0_i32, %c0_i32_0 : i32, i32
  }
  func.func @transform_3(%arg0: i32) -> (i32, i32) {
    %c0_i32 = arith.constant 0 : i32
    %c0_i32_0 = arith.constant 0 : i32
    return %arg0, %c0_i32 : i32, i32
  }
  func.func @transform_4(%arg0: i32) -> (i32, i32) {
    %c0_i32 = arith.constant 0 : i32
    %c0_i32_0 = arith.constant 0 : i32
    return %arg0, %c0_i32 : i32, i32
  }
}

</mosaic_0001>

<bundles_post_ra>
// kernel: basic_wide_res_block.5
= control target key start
LH: loop header
LB: loop body
LE: loop exit
PB: predicated region body
PF: predicated region fallthrough
CT: control target
= control target key end

     0   :  { %s391_s0 = inlined_call_operand.vmem [shape: f32[128,128], index: 0, kind: input, shape index: {}]   ;;  %s392_s1 = inlined_call_operand.vmem [shape: f32[1,128], index: 1, kind: input, shape index: {}]   ;;  %s393_s2 = inlined_call_operand.vmem [shape: f32[1,128], index: 2, kind: input, shape index: {}]   ;;  %s394_s3 = inlined_call_operand.vmem [shape: bf16[128,128], index: 3, kind: output, shape index: {}]  }
   0x1   :  { %v14_v0 = vld [vmem:[%s391_s0] sm:$0xff]  ;;  %v15_v1 = vld [vmem:[%s391_s0 + $0x8] sm:$0xff]  ;;  %v16_v6 = vld [vmem:[%s391_s0 + $0x10] sm:$0xff] }
   0x2   :  { %v286_v2 = vld [vmem:[%s392_s1] ss:$0 sm:$0xff]  ;;  %v17_v7 = vld [vmem:[%s391_s0 + $0x18] sm:$0xff]  ;;  %v19_v11 = vld [vmem:[%s391_s0 + $0x28] sm:$0xff] }
   0x3   :  { %v37_v3 = vmul.f32 %v286_v2, %v14_v0  ;;  %v38_v4 = vmul.f32 %v286_v2, %v15_v1  ;;  %v293_v5 = vld [vmem:[%s393_s2] ss:$0 sm:$0xff]  ;;  %v39_v8 = vmul.f32 %v286_v2, %v16_v6  ;;  %v40_v9 = vmul.f32 %v286_v2, %v17_v7  ;;  %v20_v12 = vld [vmem:[%s391_s0 + $0x30] sm:$0xff]  ;;  %v21_v17 = vld [vmem:[%s391_s0 + $0x38] sm:$0xff] }
   0x4   :  { %v18_v10 = vld [vmem:[%s391_s0 + $0x20] sm:$0xff]  ;;  %v42_v16 = vmul.f32 %v286_v2, %v19_v11  ;;  %v43_v20 = vmul.f32 %v286_v2, %v20_v12  ;;  %v44_v21 = vmul.f32 %v286_v2, %v21_v17  ;;  %v23_v27 = vld [vmem:[%s391_s0 + $0x48] sm:$0xff]  ;;  %v24_v32 = vld [vmem:[%s391_s0 + $0x50] sm:$0xff] }
   0x5   :  { %v60_v13 = vadd.f32 %v293_v5, %v37_v3  ;;  %v61_v14 = vadd.f32 %v293_v5, %v38_v4  ;;  %v41_v15 = vmul.f32 %v286_v2, %v18_v10  ;;  %v62_v18 = vadd.f32 %v293_v5, %v39_v8  ;;  %v22_v22 = vld [vmem:[%s391_s0 + $0x40] sm:$0xff]  ;;  %v25_v33 = vld [vmem:[%s391_s0 + $0x58] sm:$0xff]  ;;  %v27_v39 = vld [vmem:[%s391_s0 + $0x68] sm:$0xff] }
   0x6   :  { %v63_v19 = vadd.f32 %v293_v5, %v40_v9  ;;  %v65_v26 = vadd.f32 %v293_v5, %v42_v16  ;;  %v66_v30 = vadd.f32 %v293_v5, %v43_v20  ;;  %v67_v31 = vadd.f32 %v293_v5, %v44_v21  ;;  %v26_v38 = vld [vmem:[%s391_s0 + $0x60] sm:$0xff]  ;;  %v28_v44 = vld [vmem:[%s391_s0 + $0x70] sm:$0xff]  ;;  %v29_v49 = vld [vmem:[%s391_s0 + $0x78] sm:$0xff] }
   0x7   :  { %v76_v23 = vmax.f32 %v60_v13, 0.0  ;;  %v77_v24 = vmax.f32 %v61_v14, 0.0  ;;  %v64_v25 = vadd.f32 %v293_v5, %v41_v15  ;;  %v78_v28 = vmax.f32 %v62_v18, 0.0 }
   0x8   :  { %v79_v29 = vmax.f32 %v63_v19, 0.0  ;;  %v81_v36 = vmax.f32 %v65_v26, 0.0  ;;  %v45_v37 = vmul.f32 %v286_v2, %v22_v22  ;;  %v82_v41 = vmax.f32 %v66_v30, 0.0 }
   0x9   :  { %v213_v34 = vpack.c.bf16 %v77_v24, %v76_v23  ;;  %v80_v35 = vmax.f32 %v64_v25, 0.0  ;;  %v83_v42 = vmax.f32 %v67_v31, 0.0  ;;  %v46_v43 = vmul.f32 %v286_v2, %v23_v27 }
   0xa   :  { %v218_v40 = vpack.c.bf16 %v79_v29, %v78_v28  ;;  %v68_v46 = vadd.f32 %v293_v5, %v45_v37  ;;  %v47_v47 = vmul.f32 %v286_v2, %v24_v32  ;;  %v48_v48 = vmul.f32 %v286_v2, %v25_v33 }
   0xb   :  { %214 = vst [vmem:[%s394_s3] sm:$0xff] %v213_v34   ;;  %v223_v45 = vpack.c.bf16 %v81_v36, %v80_v35  ;;  %v228_v50 = vpack.c.bf16 %v83_v42, %v82_v41  ;;  %v69_v51 = vadd.f32 %v293_v5, %v46_v43  ;;  %v49_v52 = vmul.f32 %v286_v2, %v26_v38 }
   0xc   :  { %250 = vst [vmem:[%s394_s3 + $0x8] sm:$0xff] %v218_v40   ;;  %v50_v53 = vmul.f32 %v286_v2, %v27_v39  ;;  %v84_v54 = vmax.f32 %v68_v46, 0.0  ;;  %v70_v55 = vadd.f32 %v293_v5, %v47_v47  ;;  %v71_v56 = vadd.f32 %v293_v5, %v48_v48 }
   0xd   :  { %251 = vst [vmem:[%s394_s3 + $0x10] sm:$0xff] %v223_v45   ;;  %v51_v57 = vmul.f32 %v286_v2, %v28_v44  ;;  %252 = vst [vmem:[%s394_s3 + $0x18] sm:$0xff] %v228_v50   ;;  %v85_v58 = vmax.f32 %v69_v51, 0.0  ;;  %v72_v59 = vadd.f32 %v293_v5, %v49_v52  ;;  %v52_v61 = vmul.f32 %v286_v2, %v29_v49 }
   0xe   :  { %v73_v60 = vadd.f32 %v293_v5, %v50_v53  ;;  %v86_v62 = vmax.f32 %v70_v55, 0.0  ;;  %v87_v63 = vmax.f32 %v71_v56, 0.0 }
   0xf   :  { %v74_v0 = vadd.f32 %v293_v5, %v51_v57  ;;  %v233_v1 = vpack.c.bf16 %v85_v58, %v84_v54  ;;  %v88_v3 = vmax.f32 %v72_v59, 0.0  ;;  %v75_v6 = vadd.f32 %v293_v5, %v52_v61 }
  0x10   :  { %v89_v4 = vmax.f32 %v73_v60, 0.0  ;;  %v238_v7 = vpack.c.bf16 %v87_v63, %v86_v62 }
  0x11   :  { %v90_v8 = vmax.f32 %v74_v0, 0.0  ;;  %253 = vst [vmem:[%s394_s3 + $0x20] sm:$0xff] %v233_v1   ;;  %v91_v10 = vmax.f32 %v75_v6, 0.0 }
  0x12   :  { %v243_v9 = vpack.c.bf16 %v89_v4, %v88_v3  ;;  %254 = vst [vmem:[%s394_s3 + $0x28] sm:$0xff] %v238_v7  }
  0x13   :  { %v248_v2 = vpack.c.bf16 %v91_v10, %v90_v8 }
  0x14   :  { %255 = vst [vmem:[%s394_s3 + $0x30] sm:$0xff] %v243_v9  }
  0x15   :  { %256 = vst [vmem:[%s394_s3 + $0x38] sm:$0xff] %v248_v2  }

// kernel: basic_wide_res_block.4
= control target key start
LH: loop header
LB: loop body
LE: loop exit
PB: predicated region body
PF: predicated region fallthrough
CT: control target
= control target key end

     0   :  { %v435_v16 = vmov 0.0   ;;  %s575_s1 = inlined_call_operand.vmem [shape: bf16[128,128], index: 1, kind: input, shape index: {}]   ;;  %s576_s0 = inlined_call_operand.vmem [shape: bf16[128,128], index: 0, kind: input, shape index: {}]   ;;  %s577_s3 = inlined_call_operand.vmem [shape: f32[1,128], index: 3, kind: output, shape index: {1}]   ;;  %s578_s4 = inlined_call_operand.vmem [shape: f32[1,128], index: 4, kind: output, shape index: {2}]   ;;  %s579_s2 = inlined_call_operand.vmem [shape: f32[128,128], index: 2, kind: output, shape index: {0}]  }
   0x1   :  { %v419_v0 = vld [vmem:[%s575_s1 + $0x38] sm:$0xff]   ;;  %v420_v1 = vld [vmem:[%s575_s1 + $0x30] sm:$0xff]   ;;  %v421_v2 = vld [vmem:[%s575_s1 + $0x28] sm:$0xff]   ;;  %19 = vst [vmem:[%s577_s3] sm:$0x1] %v435_v16 }
   0x2   :  { %370 = vmatprep.subr.bf16.mxu0 %v419_v0  ;;  %402 = vmatprep.subr.bf16.mxu1 %v419_v0  ;;  %v422_v3 = vld [vmem:[%s575_s1 + $0x20] sm:$0xff]   ;;  %v423_v5 = vld [vmem:[%s575_s1 + $0x18] sm:$0xff]   ;;  %v424_v7 = vld [vmem:[%s575_s1 + $0x10] sm:$0xff]   ;;  %20 = vst [vmem:[%s578_s4] sm:$0x1] %v435_v16 }
   0x3   :  { %371 = vmatpush3.bf16.msra.mxu0 %v419_v0  ;;  %410 = vmatpush3.bf16.msra.mxu1 %v419_v0  ;;  %v427_v4 = vld [vmem:[%s576_s0] sm:$0xff]   ;;  %v425_v8 = vld [vmem:[%s575_s1 + $0x8] sm:$0xff]   ;;  %v429_v12 = vld [vmem:[%s576_s0 + $0x10] sm:$0xff]  }
   0x4   :  { %372 = vmatprep.subr.bf16.mxu0 %v420_v1  ;;  %403 = vmatprep.subr.bf16.mxu1 %v420_v1  ;;  %v431_v6 = vld [vmem:[%s576_s0 + $0x20] sm:$0xff]   ;;  %v428_v10 = vld [vmem:[%s576_s0 + $0x8] sm:$0xff]   ;;  %v433_v13 = vld [vmem:[%s576_s0 + $0x30] sm:$0xff]  }
   0x5   :  { %386 = vmatprep.mubr.bf16.mxu0 %v427_v4  ;;  %394 = vmatprep.mubr.bf16.mxu1 %v431_v6  ;;  %v426_v9 = vld [vmem:[%s575_s1] sm:$0xff]   ;;  %v432_v11 = vld [vmem:[%s576_s0 + $0x28] sm:$0xff]   ;;  %v430_v14 = vld [vmem:[%s576_s0 + $0x18] sm:$0xff]  }
   0x6   :  { %v434_v15 = vld [vmem:[%s576_s0 + $0x38] sm:$0xff]  }
   0x7   :  { %373 = vmatpush3.bf16.msra.mxu0 %v420_v1  ;;  %411 = vmatpush3.bf16.msra.mxu1 %v420_v1 }
   0x8   :  { %374 = vmatprep.subr.bf16.mxu0 %v421_v2  ;;  %404 = vmatprep.subr.bf16.mxu1 %v421_v2 }
   0xb   :  { %375 = vmatpush3.bf16.msra.mxu0 %v421_v2  ;;  %412 = vmatpush3.bf16.msra.mxu1 %v421_v2 }
   0xc   :  { %376 = vmatprep.subr.bf16.mxu0 %v422_v3  ;;  %405 = vmatprep.subr.bf16.mxu1 %v422_v3 }
   0xf   :  { %377 = vmatpush3.bf16.msra.mxu0 %v422_v3  ;;  %413 = vmatpush3.bf16.msra.mxu1 %v422_v3 }
  0x10   :  { %378 = vmatprep.subr.bf16.mxu0 %v423_v5  ;;  %406 = vmatprep.subr.bf16.mxu1 %v423_v5 }
  0x13   :  { %379 = vmatpush3.bf16.msra.mxu0 %v423_v5  ;;  %414 = vmatpush3.bf16.msra.mxu1 %v423_v5 }
  0x14   :  { %380 = vmatprep.subr.bf16.mxu0 %v424_v7  ;;  %407 = vmatprep.subr.bf16.mxu1 %v424_v7 }
  0x17   :  { %381 = vmatpush3.bf16.msra.mxu0 %v424_v7  ;;  %415 = vmatpush3.bf16.msra.mxu1 %v424_v7 }
  0x18   :  { %382 = vmatprep.subr.bf16.mxu0 %v425_v8  ;;  %408 = vmatprep.subr.bf16.mxu1 %v425_v8 }
  0x1b   :  { %383 = vmatpush3.bf16.msra.mxu0 %v425_v8  ;;  %416 = vmatpush3.bf16.msra.mxu1 %v425_v8 }
  0x1c   :  { %384 = vmatprep.subr.bf16.mxu0 %v426_v9  ;;  %409 = vmatprep.subr.bf16.mxu1 %v426_v9 }
  0x1f   :  { %385 = vmatpush3.bf16.msra.mxu0 %v426_v9  ;;  %417 = vmatpush3.bf16.msra.mxu1 %v426_v9 }
  0x22   :  { %387 = vmatmul.mubr.bf16.vlgmr.msra.gmra.mxu0 %v428_v10  ;;  %395 = vmatmul.mubr.bf16.vlgmr.msra.gmra.mxu1 %v432_v11 }
  0x23   :  { %390 = vmatprep.mubr.bf16.mxu0 %v429_v12  ;;  %398 = vmatprep.mubr.bf16.mxu1 %v433_v13 }
  0x2a   :  { %391 = vmatmul.mubr.bf16.gmra.mxu0 %v430_v14  ;;  %399 = vmatmul.mubr.bf16.gmra.mxu1 %v434_v15 }
  0xe2   :  { %v388_v17 = vpop.f32.mrf.mxu0  ;;  %v396_v18 = vpop.f32.mrf.mxu1 }
  0xe3   :  { %248 = vst [vmem:[%s579_s2 + $0x10] sm:$0xff] %v388_v17  ;;  %256 = vst [vmem:[%s579_s2 + $0x50] sm:$0xff] %v396_v18  ;;  %v289_v30 = vmul.f32 %v388_v17, %v388_v17  ;;  %v297_v60 = vmul.f32 %v396_v18, %v396_v18 }
  0xe4   :  { %v183_v19 = vpop.f32.mrf.mxu0  ;;  %v215_v20 = vpop.f32.mrf.mxu1 }
  0xe5   :  { %246 = vst [vmem:[%s579_s2] sm:$0xff] %v183_v19  ;;  %254 = vst [vmem:[%s579_s2 + $0x40] sm:$0xff] %v215_v20  ;;  %v287_v25 = vmul.f32 %v183_v19, %v183_v19  ;;  %v295_v54 = vmul.f32 %v215_v20, %v215_v20 }
  0xe6   :  { %v389_v21 = vpop.f32.mrf.mxu0  ;;  %v397_v22 = vpop.f32.mrf.mxu1 }
  0xe7   :  { %249 = vst [vmem:[%s579_s2 + $0x18] sm:$0xff] %v389_v21  ;;  %257 = vst [vmem:[%s579_s2 + $0x58] sm:$0xff] %v397_v22  ;;  %v290_v35 = vmul.f32 %v389_v21, %v389_v21  ;;  %v298_v63 = vmul.f32 %v397_v22, %v397_v22 }
  0xe8   :  { %v186_v23 = vpop.f32.mrf.mxu0  ;;  %v218_v24 = vpop.f32.mrf.mxu1 }
  0xe9   :  { %247 = vst [vmem:[%s579_s2 + $0x8] sm:$0xff] %v186_v23  ;;  %v263_v26 = vadd.f32 %v186_v23, %v183_v19  ;;  %v288_v27 = vmul.f32 %v186_v23, %v186_v23  ;;  %255 = vst [vmem:[%s579_s2 + $0x48] sm:$0xff] %v218_v24  ;;  %v296_v58 = vmul.f32 %v218_v24, %v218_v24 }
  0xea   :  { %v392_v28 = vpop.f32.mrf.mxu0  ;;  %v400_v29 = vpop.f32.mrf.mxu1 }
  0xeb   :  { %v264_v31 = vadd.f32 %v388_v17, %v263_v26  ;;  %v303_v32 = vadd.f32 %v288_v27, %v287_v25  ;;  %252 = vst [vmem:[%s579_s2 + $0x30] sm:$0xff] %v392_v28  ;;  %260 = vst [vmem:[%s579_s2 + $0x70] sm:$0xff] %v400_v29  ;;  %v293_v48 = vmul.f32 %v392_v28, %v392_v28  ;;  %v286_v27 = vld [vmem:[%s578_s4] sm:$0x1] }
  0xec   :  { %v199_v33 = vpop.f32.mrf.mxu0  ;;  %v231_v34 = vpop.f32.mrf.mxu1  ;;  %v301_v8 = vmul.f32 %v400_v29, %v400_v29 }
  0xed   :  { %v304_v36 = vadd.f32 %v303_v32, %v289_v30  ;;  %250 = vst [vmem:[%s579_s2 + $0x20] sm:$0xff] %v199_v33  ;;  %v265_v37 = vadd.f32 %v389_v21, %v264_v31  ;;  %258 = vst [vmem:[%s579_s2 + $0x60] sm:$0xff] %v231_v34  ;;  %v291_v41 = vmul.f32 %v199_v33, %v199_v33 }
  0xee   :  { %v393_v38 = vpop.f32.mrf.mxu0  ;;  %v401_v39 = vpop.f32.mrf.mxu1  ;;  %v299_v3 = vmul.f32 %v231_v34, %v231_v34 }
  0xef   :  { %v266_v40 = vadd.f32 %v265_v37, %v199_v33  ;;  %v305_v42 = vadd.f32 %v304_v36, %v290_v35  ;;  %253 = vst [vmem:[%s579_s2 + $0x38] sm:$0xff] %v393_v38  ;;  %261 = vst [vmem:[%s579_s2 + $0x78] sm:$0xff] %v401_v39  ;;  %v294_v51 = vmul.f32 %v393_v38, %v393_v38 }
  0xf0   :  { %v202_v43 = vpop.f32.mrf.mxu0  ;;  %v234_v44 = vpop.f32.mrf.mxu1  ;;  %v302_v11 = vmul.f32 %v401_v39, %v401_v39 }
  0xf1   :  { %v306_v45 = vadd.f32 %v305_v42, %v291_v41  ;;  %251 = vst [vmem:[%s579_s2 + $0x28] sm:$0xff] %v202_v43  ;;  %v267_v46 = vadd.f32 %v266_v40, %v202_v43  ;;  %v292_v47 = vmul.f32 %v202_v43, %v202_v43  ;;  %259 = vst [vmem:[%s579_s2 + $0x68] sm:$0xff] %v234_v44 }
  0xf2   :  { %v300_v7 = vmul.f32 %v234_v44, %v234_v44 }
  0xf3   :  { %v268_v49 = vadd.f32 %v392_v28, %v267_v46  ;;  %v307_v50 = vadd.f32 %v306_v45, %v292_v47 }
  0xf5   :  { %v269_v52 = vadd.f32 %v393_v38, %v268_v49  ;;  %v308_v53 = vadd.f32 %v307_v50, %v293_v48 }
  0xf7   :  { %v309_v55 = vadd.f32 %v308_v53, %v294_v51  ;;  %v270_v56 = vadd.f32 %v269_v52, %v215_v20 }
  0xf9   :  { %v271_v57 = vadd.f32 %v270_v56, %v218_v24  ;;  %v310_v59 = vadd.f32 %v309_v55, %v295_v54  ;;  %v262_v24 = vld [vmem:[%s577_s3] sm:$0x1] }
  0xfb   :  { %v272_v61 = vadd.f32 %v396_v18, %v271_v57  ;;  %v311_v62 = vadd.f32 %v310_v59, %v296_v58 }
  0xfd   :  { %v312_v0 = vadd.f32 %v311_v62, %v297_v60  ;;  %v273_v1 = vadd.f32 %v397_v22, %v272_v61 }
  0xff   :  { %v274_v2 = vadd.f32 %v273_v1, %v231_v34  ;;  %v313_v4 = vadd.f32 %v312_v0, %v298_v63 }
 0x101   :  { %v314_v5 = vadd.f32 %v313_v4, %v299_v3  ;;  %v275_v6 = vadd.f32 %v274_v2, %v234_v44 }
 0x103   :  { %v276_v9 = vadd.f32 %v400_v29, %v275_v6  ;;  %v315_v10 = vadd.f32 %v314_v5, %v300_v7 }
 0x105   :  { %v277_v12 = vadd.f32 %v401_v39, %v276_v9  ;;  %v316_v13 = vadd.f32 %v315_v10, %v301_v8 }
 0x107   :  { %v278_v14 = vrot.slane %v277_v12, 4  ;;  %v317_v15 = vadd.f32 %v316_v13, %v302_v11 }
 0x109   :  { %v279_v16 = vadd.f32 %v278_v14, %v277_v12  ;;  %v318_v17 = vrot.slane %v317_v15, 4 }
 0x10b   :  { %v280_v18 = vrot.slane %v279_v16, 2  ;;  %v319_v19 = vadd.f32 %v318_v17, %v317_v15 }
 0x10d   :  { %v281_v20 = vadd.f32 %v280_v18, %v279_v16  ;;  %v320_v21 = vrot.slane %v319_v19, 2 }
 0x10f   :  { %v282_v22 = vrot.slane %v281_v20, 1  ;;  %v321_v23 = vadd.f32 %v320_v21, %v319_v19 }
 0x111   :  { %v283_v25 = vadd.f32 %v282_v22, %v281_v20  ;;  %v322_v26 = vrot.slane %v321_v23, 1 }
 0x113   :  { %v284_v28 = vadd.f32 %v283_v25, %v262_v24  ;;  %v323_v29 = vadd.f32 %v322_v26, %v321_v23 }
 0x115   :  { %285 = vst [vmem:[%s577_s3] sm:$0x1] %v284_v28  ;;  %v324_v30 = vadd.f32 %v323_v29, %v286_v27 }
 0x117   :  { %325 = vst [vmem:[%s578_s4] sm:$0x1] %v324_v30 }

// kernel: basic_wide_res_block.7
= control target key start
LH: loop header
LB: loop body
LE: loop exit
PB: predicated region body
PF: predicated region fallthrough
CT: control target
= control target key end

     0   :  { %vm159_vm0 = vcmask 31744   ;;  %s457_s0 = inlined_call_operand.vmem [shape: f32[128,128], index: 0, kind: input, shape index: {}]   ;;  %s458_s1 = inlined_call_operand.vmem [shape: f32[1,128], index: 1, kind: input, shape index: {}]   ;;  %s459_s2 = inlined_call_operand.vmem [shape: f32[1,128], index: 2, kind: input, shape index: {}]   ;;  %s460_s3 = inlined_call_operand.vmem [shape: f32[128,4], index: 3, kind: input, shape index: {}]   ;;  %s461_s4 = inlined_call_operand.vmem [shape: f32[128,128], index: 4, kind: output, shape index: {}]  }
   0x1   :  { %v17_v0 = vld [vmem:[%s457_s0] sm:$0xff]  ;;  %v18_v4 = vld [vmem:[%s457_s0 + $0x8] sm:$0xff]  ;;  %v19_v7 = vld [vmem:[%s457_s0 + $0x10] sm:$0xff] }
   0x2   :  { %v213_v1 = vld [vmem:[%s458_s1] ss:$0 sm:$0xff]  ;;  %v20_v8 = vld [vmem:[%s457_s0 + $0x18] sm:$0xff]  ;;  %v112_v10 = vld [vmem:[%s460_s3 + $0x8] sm:$0xff] }
   0x3   :  { %v218_v2 = vld [vmem:[%s459_s2] ss:$0 sm:$0xff]  ;;  %v40_v3 = vmul.f32 %v213_v1, %v17_v0  ;;  %v41_v6 = vmul.f32 %v213_v1, %v18_v4  ;;  %v42_v11 = vmul.f32 %v213_v1, %v19_v7  ;;  %v43_v12 = vmul.f32 %v213_v1, %v20_v8  ;;  %v113_v15 = vld [vmem:[%s460_s3 + $0x10] sm:$0xff]  ;;  %v22_v17 = vld [vmem:[%s457_s0 + $0x28] sm:$0xff] }
   0x4   :  { %v111_v5 = vld [vmem:[%s460_s3] sm:$0xff]  ;;  %v114_v22 = vld [vmem:[%s460_s3 + $0x18] sm:$0xff]  ;;  %v45_v27 = vmul.f32 %v213_v1, %v22_v17  ;;  %v23_v28 = vld [vmem:[%s457_s0 + $0x30] sm:$0xff] }
   0x5   :  { %v63_v9 = vadd.f32 %v218_v2, %v40_v3  ;;  %v21_v13 = vld [vmem:[%s457_s0 + $0x20] sm:$0xff]  ;;  %v64_v14 = vadd.f32 %v218_v2, %v41_v6  ;;  %v65_v20 = vadd.f32 %v218_v2, %v42_v11  ;;  %v66_v21 = vadd.f32 %v218_v2, %v43_v12  ;;  %v24_v29 = vld [vmem:[%s457_s0 + $0x38] sm:$0xff]  ;;  %v26_v35 = vld [vmem:[%s457_s0 + $0x48] sm:$0xff] }
   0x6   :  { %v44_v16 = vmul.f32 %v213_v1, %v21_v13  ;;  %v115_v23 = vld [vmem:[%s460_s3 + $0x20] sm:$0xff]  ;;  %v116_v40 = vld [vmem:[%s460_s3 + $0x28] sm:$0xff]  ;;  %v68_v42 = vadd.f32 %v218_v2, %v45_v27  ;;  %v46_v43 = vmul.f32 %v213_v1, %v23_v28  ;;  %v47_v44 = vmul.f32 %v213_v1, %v24_v29  ;;  %v27_v45 = vld [vmem:[%s457_s0 + $0x50] sm:$0xff] }
   0x7   :  { %v79_v18 = vmax.f32 %v63_v9, 0.0  ;;  %v127_v19 = vadd.f32 %v111_v5, %v63_v9  ;;  %v80_v24 = vmax.f32 %v64_v14, 0.0  ;;  %v128_v25 = vadd.f32 %v112_v10, %v64_v14  ;;  %v25_v34 = vld [vmem:[%s457_s0 + $0x40] sm:$0xff]  ;;  %v28_v46 = vld [vmem:[%s457_s0 + $0x58] sm:$0xff]  ;;  %v117_v49 = vld [vmem:[%s460_s3 + $0x30] sm:$0xff] }
   0x8   :  { %v67_v26 = vadd.f32 %v218_v2, %v44_v16  ;;  %v81_v31 = vmax.f32 %v65_v20, 0.0  ;;  %v129_v32 = vadd.f32 %v113_v15, %v65_v20  ;;  %v82_v33 = vmax.f32 %v66_v21, 0.0  ;;  %v118_v56 = vld [vmem:[%s460_s3 + $0x38] sm:$0xff]  ;;  %v119_v57 = vld [vmem:[%s460_s3 + $0x40] sm:$0xff]  ;;  %v120_v60 = vld [vmem:[%s460_s3 + $0x48] sm:$0xff] }
   0x9   :  { %95 = vst [vmem:[%s461_s4] sm:$0xff] %v79_v18  ;;  %v143_v30 = vmax.f32 %v127_v19, 0.0  ;;  %96 = vst [vmem:[%s461_s4 + $0x8] sm:$0xff] %v80_v24  ;;  %v144_v36 = vmax.f32 %v128_v25, 0.0  ;;  %v130_v37 = vadd.f32 %v114_v22, %v66_v21  ;;  %v48_v50 = vmul.f32 %v213_v1, %v25_v34  ;;  %v29_v5 = vld [vmem:[%s457_s0 + $0x60] sm:$0xff]  ;;  %v30_v6 = vld [vmem:[%s457_s0 + $0x68] sm:$0xff] }
   0xa   :  { %v83_v38 = vmax.f32 %v67_v26, 0.0  ;;  %v131_v39 = vadd.f32 %v115_v23, %v67_v26  ;;  %97 = vst [vmem:[%s461_s4 + $0x10] sm:$0xff] %v81_v31  ;;  %v145_v41 = vmax.f32 %v129_v32, 0.0  ;;  %98 = vst [vmem:[%s461_s4 + $0x18] sm:$0xff] %v82_v33  ;;  %v49_v51 = vmul.f32 %v213_v1, %v26_v35  ;;  %v121_v11 = vld [vmem:[%s460_s3 + $0x50] sm:$0xff]  ;;  %v122_v16 = vld [vmem:[%s460_s3 + $0x58] sm:$0xff] }
   0xb   :  { %160 = vst.msk [vmem:[%s461_s4] sm:$0xff] %vm159_vm0, %v143_v30  ;;  %v146_v47 = vmax.f32 %v130_v37, 0.0  ;;  %161 = vst.msk [vmem:[%s461_s4 + $0x8] sm:$0xff] %vm159_vm0, %v144_v36  ;;  %v84_v52 = vmax.f32 %v68_v42, 0.0  ;;  %v132_v53 = vadd.f32 %v116_v40, %v68_v42  ;;  %v69_v54 = vadd.f32 %v218_v2, %v46_v43  ;;  %v31_v17 = vld [vmem:[%s457_s0 + $0x70] sm:$0xff]  ;;  %v32_v22 = vld [vmem:[%s457_s0 + $0x78] sm:$0xff] }
   0xc   :  { %99 = vst [vmem:[%s461_s4 + $0x20] sm:$0xff] %v83_v38  ;;  %v147_v48 = vmax.f32 %v131_v39, 0.0  ;;  %v70_v55 = vadd.f32 %v218_v2, %v47_v44  ;;  %162 = vst.msk [vmem:[%s461_s4 + $0x10] sm:$0xff] %vm159_vm0, %v145_v41  ;;  %v71_v58 = vadd.f32 %v218_v2, %v48_v50  ;;  %v72_v59 = vadd.f32 %v218_v2, %v49_v51  ;;  %v123_v27 = vld [vmem:[%s460_s3 + $0x60] sm:$0xff]  ;;  %v124_v31 = vld [vmem:[%s460_s3 + $0x68] sm:$0xff] }
   0xd   :  { %v50_v61 = vmul.f32 %v213_v1, %v27_v45  ;;  %v51_v62 = vmul.f32 %v213_v1, %v28_v46  ;;  %163 = vst.msk [vmem:[%s461_s4 + $0x18] sm:$0xff] %vm159_vm0, %v146_v47  ;;  %100 = vst [vmem:[%s461_s4 + $0x28] sm:$0xff] %v84_v52  ;;  %v148_v63 = vmax.f32 %v132_v53, 0.0  ;;  %v85_v0 = vmax.f32 %v69_v54, 0.0  ;;  %v125_v39 = vld [vmem:[%s460_s3 + $0x70] sm:$0xff] }
   0xe   :  { %164 = vst.msk [vmem:[%s461_s4 + $0x20] sm:$0xff] %vm159_vm0, %v147_v48  ;;  %v133_v3 = vadd.f32 %v117_v49, %v69_v54  ;;  %v86_v4 = vmax.f32 %v70_v55, 0.0  ;;  %v134_v7 = vadd.f32 %v118_v56, %v70_v55  ;;  %v87_v8 = vmax.f32 %v71_v58, 0.0 }
   0xf   :  { %v135_v9 = vadd.f32 %v119_v57, %v71_v58  ;;  %v88_v10 = vmax.f32 %v72_v59, 0.0  ;;  %101 = vst [vmem:[%s461_s4 + $0x30] sm:$0xff] %v85_v0  ;;  %v136_v13 = vadd.f32 %v120_v60, %v72_v59  ;;  %v73_v14 = vadd.f32 %v218_v2, %v50_v61  ;;  %165 = vst.msk [vmem:[%s461_s4 + $0x28] sm:$0xff] %vm159_vm0, %v148_v63 }
  0x10   :  { %v149_v12 = vmax.f32 %v133_v3, 0.0  ;;  %102 = vst [vmem:[%s461_s4 + $0x38] sm:$0xff] %v86_v4  ;;  %v74_v15 = vadd.f32 %v218_v2, %v51_v62  ;;  %v150_v18 = vmax.f32 %v134_v7, 0.0  ;;  %103 = vst [vmem:[%s461_s4 + $0x40] sm:$0xff] %v87_v8  ;;  %v52_v20 = vmul.f32 %v213_v1, %v29_v5 }
  0x11   :  { %v151_v19 = vmax.f32 %v135_v9, 0.0  ;;  %104 = vst [vmem:[%s461_s4 + $0x48] sm:$0xff] %v88_v10  ;;  %v53_v21 = vmul.f32 %v213_v1, %v30_v6  ;;  %v152_v23 = vmax.f32 %v136_v13, 0.0  ;;  %v89_v24 = vmax.f32 %v73_v14, 0.0 }
  0x12   :  { %v137_v25 = vadd.f32 %v121_v11, %v73_v14  ;;  %v90_v26 = vmax.f32 %v74_v15, 0.0  ;;  %166 = vst.msk [vmem:[%s461_s4 + $0x30] sm:$0xff] %vm159_vm0, %v149_v12  ;;  %v138_v28 = vadd.f32 %v122_v16, %v74_v15  ;;  %v75_v29 = vadd.f32 %v218_v2, %v52_v20  ;;  %167 = vst.msk [vmem:[%s461_s4 + $0x38] sm:$0xff] %vm159_vm0, %v150_v18 }
  0x13   :  { %v76_v30 = vadd.f32 %v218_v2, %v53_v21  ;;  %v54_v32 = vmul.f32 %v213_v1, %v31_v17  ;;  %168 = vst.msk [vmem:[%s461_s4 + $0x40] sm:$0xff] %vm159_vm0, %v151_v19  ;;  %105 = vst [vmem:[%s461_s4 + $0x50] sm:$0xff] %v89_v24  ;;  %v55_v34 = vmul.f32 %v213_v1, %v32_v22  ;;  %v126_v1 = vld [vmem:[%s460_s3 + $0x78] sm:$0xff] }
  0x14   :  { %v153_v33 = vmax.f32 %v137_v25, 0.0  ;;  %106 = vst [vmem:[%s461_s4 + $0x58] sm:$0xff] %v90_v26  ;;  %169 = vst.msk [vmem:[%s461_s4 + $0x48] sm:$0xff] %vm159_vm0, %v152_v23  ;;  %v154_v35 = vmax.f32 %v138_v28, 0.0  ;;  %v91_v36 = vmax.f32 %v75_v29, 0.0  ;;  %v139_v37 = vadd.f32 %v123_v27, %v75_v29 }
  0x15   :  { %v92_v38 = vmax.f32 %v76_v30, 0.0  ;;  %v140_v40 = vadd.f32 %v124_v31, %v76_v30  ;;  %v77_v41 = vadd.f32 %v218_v2, %v54_v32  ;;  %v78_v42 = vadd.f32 %v218_v2, %v55_v34 }
  0x16   :  { %170 = vst.msk [vmem:[%s461_s4 + $0x50] sm:$0xff] %vm159_vm0, %v153_v33  ;;  %107 = vst [vmem:[%s461_s4 + $0x60] sm:$0xff] %v91_v36  ;;  %v155_v43 = vmax.f32 %v139_v37, 0.0 }
  0x17   :  { %108 = vst [vmem:[%s461_s4 + $0x68] sm:$0xff] %v92_v38  ;;  %171 = vst.msk [vmem:[%s461_s4 + $0x58] sm:$0xff] %vm159_vm0, %v154_v35  ;;  %v156_v2 = vmax.f32 %v140_v40, 0.0  ;;  %v93_v44 = vmax.f32 %v77_v41, 0.0  ;;  %v141_v45 = vadd.f32 %v125_v39, %v77_v41  ;;  %v94_v46 = vmax.f32 %v78_v42, 0.0 }
  0x18   :  { %v142_v47 = vadd.f32 %v126_v1, %v78_v42  ;;  %172 = vst.msk [vmem:[%s461_s4 + $0x60] sm:$0xff] %vm159_vm0, %v155_v43 }
  0x19   :  { %109 = vst [vmem:[%s461_s4 + $0x70] sm:$0xff] %v93_v44  ;;  %v157_v48 = vmax.f32 %v141_v45, 0.0  ;;  %110 = vst [vmem:[%s461_s4 + $0x78] sm:$0xff] %v94_v46 }
  0x1a   :  { %173 = vst.msk [vmem:[%s461_s4 + $0x68] sm:$0xff] %vm159_vm0, %v156_v2  ;;  %v158_v49 = vmax.f32 %v142_v47, 0.0 }
  0x1b   :  { %174 = vst.msk [vmem:[%s461_s4 + $0x70] sm:$0xff] %vm159_vm0, %v157_v48 }
  0x1c   :  { %175 = vst.msk [vmem:[%s461_s4 + $0x78] sm:$0xff] %vm159_vm0, %v158_v49 }

</bundles_post_ra>
